<compile_context>
chip_gen: v5e
topology: v5e:2x2
jax: 0.10.0
libtpu: 0.0.40
codegen_flags: <defaults>
</compile_context>

<pallas_src>
import functools
import math

import jax
import jax.numpy as jnp
from jax.experimental import pallas as pl
from jax.experimental.pallas import tpu as pltpu

_LANES = 128
_VMEM_BUDGET = 48 << 20  # conservative vs. v7x's 64 MiB physical VMEM


def _if_kernel(x_ref, vth_ref, o_ref, mem_ref, *, timesteps, alpha):
    """Integrate-and-fire over the time axis for one (T, tile_r, 128) block.

    x_ref  : (T, tile_r, 128) VMEM block of input currents
    vth_ref: (1,)             SMEM scalar threshold (already clamped by Vth_bound)
    o_ref  : (T, tile_r, 128) VMEM block of output spikes
    mem_ref: (tile_r, 128)    f32 VMEM scratch membrane potential
    """
    vth = vth_ref[0]
    thresh = alpha * vth

    # Scratch persists across grid steps -> re-zero per block.
    mem_ref[...] = jnp.zeros_like(mem_ref)

    # Small fixed trip count (T ~ 8): keep the recurrence unrolled in Python.
    for t in range(timesteps):
        mem = mem_ref[...] + x_ref[t].astype(jnp.float32)
        spike = jnp.where(mem >= thresh, vth, jnp.float32(0.0))
        mem_ref[...] = mem - spike
        o_ref[t] = spike.astype(o_ref.dtype)


def if_neuron_forward(x, vth, *, timesteps, alpha, vth_bound, max_tile_rows=1024):
    """Forward pass of IFNeuron.

    x   : (timesteps*B, C, H, W) float array
    vth : scalar threshold parameter
    Returns spikes of the same shape/dtype as x (== torch.cat(spikes, 0)).
    """
    tb = x.shape[0]
    chw = x.shape[1:]
    assert tb % timesteps == 0, "leading dim must be timesteps * batch"
    b = tb // timesteps
    n = b * math.prod(chw)
    itemsize = jnp.dtype(x.dtype).itemsize

    # In-place Vth clamp from the module: Vth <- relu(Vth - Vth_bound) + Vth_bound
    vth_clamped = jnp.maximum(jnp.asarray(vth, jnp.float32) - vth_bound, 0.0) + vth_bound
    vth_arr = vth_clamped.reshape((1,))

    # Flatten to (T, R, 128). Only 128-lane alignment is required; R need not be
    # a multiple of 8 (the (8,128) constraint applies to the BlockSpec tile).
    n_pad = ((n + _LANES - 1) // _LANES) * _LANES
    x2 = x.reshape(timesteps, n)
    if n_pad != n:
        # Rare fallback (N not a multiple of 128); costs one extra HBM pass.
        x2 = jnp.pad(x2, ((0, 0), (0, n_pad - n)))
    r = n_pad // _LANES
    x3 = x2.reshape(timesteps, r, _LANES)

    # --- tile-size selection -------------------------------------------------
    # VMEM cap: double-buffered in + out blocks + f32 accumulator scratch.
    bytes_per_row = 4 * timesteps * _LANES * itemsize + _LANES * 4
    max_rows_by_vmem = max(8, ((_VMEM_BUDGET - (4 << 20)) // bytes_per_row) // 8 * 8)

    tile_r = min(max_tile_rows, max_rows_by_vmem, r)
    if r > 8:
        # Ensure grid >= 2 so v7x's two TensorCores both get work.
        half = max(8, (pl.cdiv(r, 2) // 8) * 8)
        tile_r = min(tile_r, half)
    if tile_r != r:
        # Block row dim must be a multiple of 8 unless it spans the full axis.
        tile_r = max(8, (tile_r // 8) * 8)

    grid = (pl.cdiv(r, tile_r),)
    # Ragged last block: out-of-bounds rows are read as garbage and their writes
    # discarded; rows are independent, so in-bounds rows are unaffected.

    block_bytes = timesteps * tile_r * _LANES * itemsize
    needed = 4 * block_bytes + tile_r * _LANES * 4 + (4 << 20)
    vmem_limit_bytes = int(min(max(needed, 32 << 20), _VMEM_BUDGET))

    kernel = functools.partial(_if_kernel, timesteps=timesteps, alpha=alpha)

    out3 = pl.pallas_call(
        kernel,
        out_shape=jax.ShapeDtypeStruct((timesteps, r, _LANES), x.dtype),
        grid_spec=pltpu.PrefetchScalarGridSpec(
            num_scalar_prefetch=0,
            grid=grid,
            in_specs=[
                pl.BlockSpec((timesteps, tile_r, _LANES), lambda i: (0, i, 0)),
                pl.BlockSpec(memory_space=pltpu.MemorySpace.SMEM),
            ],
            out_specs=pl.BlockSpec((timesteps, tile_r, _LANES), lambda i: (0, i, 0)),
            scratch_shapes=[pltpu.VMEM((tile_r, _LANES), jnp.float32)],
        ),
        compiler_params=pltpu.CompilerParams(
            dimension_semantics=("parallel",),
            vmem_limit_bytes=vmem_limit_bytes,
        ),
    )(x3, vth_arr)

    if n_pad != n:
        out = out3.reshape(timesteps, n_pad)[:, :n].reshape(tb, *chw)
    else:
        out = out3.reshape(tb, *chw)
    return out


def _if_reference(x, vth, *, timesteps, alpha, vth_bound):
    """Pure-JAX reference matching the PyTorch IFFunction.forward."""
    vth = jnp.maximum(vth - vth_bound, 0.0) + vth_bound
    tb = x.shape[0]
    chw = x.shape[1:]
    xr = x.reshape(timesteps, tb // timesteps, *chw)
    mem = jnp.zeros(xr.shape[1:], dtype=jnp.float32)
    spikes = []
    for t in range(timesteps):
        mem = mem + xr[t]
        spike = (mem >= alpha * vth).astype(x.dtype) * vth
        mem = mem - spike
        spikes.append(spike)
    return jnp.concatenate(spikes, 0)


if __name__ == "__main__":
    # snn_setting (deterministic, in-script)
    snn_setting = dict(timesteps=8, Vth=1.0, alpha=0.5, Vth_bound=0.0005,
                       train_Vth=True, rate_stat=False)
    T = snn_setting["timesteps"]
    vth = jnp.float32(snn_setting["Vth"])
    kw = dict(timesteps=T, alpha=snn_setting["alpha"], vth_bound=snn_setting["Vth_bound"])

    key = jax.random.PRNGKey(0)
    k1, k2, k3 = jax.random.split(key, 3)

    # Main case: B=2, C=4, H=W=16 -> N=2048, r=16, tile_r=8, grid=(2,) (multi-block).
    x = jax.random.normal(k1, (T * 2, 4, 16, 16), dtype=jnp.float32)
    out = jax.block_until_ready(if_neuron_forward(x, vth, **kw))
    ref = _if_reference(x, vth, **kw)
    assert out.shape == x.shape and out.dtype == x.dtype
    assert jnp.allclose(out, ref, atol=1e-6), "mismatch vs reference (even grid)"

    # Ragged last grid block: N = 2*4*16*20 = 2560 -> r=20, tile_r=8, grid=(3,).
    xr_ = jax.random.normal(k2, (T * 2, 4, 16, 20), dtype=jnp.float32)
    outr = jax.block_until_ready(if_neuron_forward(xr_, vth, **kw))
    assert jnp.allclose(outr, _if_reference(xr_, vth, **kw), atol=1e-6), \
        "mismatch vs reference (ragged grid)"

    # Pad fallback path: N = 2*3*5*5 = 150 (not a multiple of 128).
    xp = jax.random.normal(k3, (T * 2, 3, 5, 5), dtype=jnp.float32)
    outp = jax.block_until_ready(if_neuron_forward(xp, vth, **kw))
    assert jnp.allclose(outp, _if_reference(xp, vth, **kw), atol=1e-6), \
        "mismatch vs reference (pad fallback)"

    # TODO(synk): backward pass (rate-coding surrogate gradient), RateStatus
    # firing-rate bookkeeping, and distributed all-reduce are training/stat-side
    # features outside the forward kernel and are not implemented here.
    print("KERNEL_OK")
</pallas_src>

<mosaic_0001>
module attributes {stable_mosaic.version = 11 : i64} {
  func.func @_if_kernel(%arg0: i32, %arg1: memref<8x8x128xf32, #tpu.memory_space<vmem>>, %arg2: memref<1xf32, #tpu.memory_space<smem>>, %arg3: memref<8x8x128xf32, #tpu.memory_space<vmem>>, %arg4: memref<8x128xf32, #tpu.memory_space<vmem>>) attributes {dimension_semantics = [#tpu.dimension_semantics<parallel>], iteration_bounds = array<i64: 2>, scalar_prefetch = 0 : i64, scratch_operands = 1 : i64, tpu.core_type = #tpu.core_type<tc>, window_params = [{transform_indices = @transform_0, window_bounds = array<i64: 8, 8, 128>}, {transform_indices = @transform_1, window_bounds = array<i64: 1>}, {transform_indices = @transform_2, window_bounds = array<i64: 8, 8, 128>}]} {
    %c0 = arith.constant 0 : index
    %0 = memref.load %arg2[%c0] : memref<1xf32, #tpu.memory_space<smem>>
    %cst = arith.constant 5.000000e-01 : f32
    %1 = arith.mulf %cst, %0 : f32
    %cst_0 = arith.constant 0.000000e+00 : f32
    %2 = vector.broadcast %cst_0 : f32 to vector<8x128xf32>
    %c0_1 = arith.constant 0 : index
    %c0_2 = arith.constant 0 : index
    %3 = vector.load %arg4[%c0_1, %c0_2] : memref<8x128xf32, #tpu.memory_space<vmem>>, vector<8x128xf32>
    tpu.vector_store %arg4[%c0_1, %c0_2], %2 {strides = array<i32>} : memref<8x128xf32, #tpu.memory_space<vmem>>, vector<8x128xf32>,
    %c0_3 = arith.constant 0 : index
    %c0_4 = arith.constant 0 : index
    %4 = vector.load %arg4[%c0_3, %c0_4] : memref<8x128xf32, #tpu.memory_space<vmem>>, vector<8x128xf32>
    %c0_5 = arith.constant 0 : index
    %c0_6 = arith.constant 0 : index
    %c0_7 = arith.constant 0 : index
    %5 = vector.load %arg1[%c0_5, %c0_6, %c0_7] : memref<8x8x128xf32, #tpu.memory_space<vmem>>, vector<1x8x128xf32>
    %6 = vector.shape_cast %5 : vector<1x8x128xf32> to vector<8x128xf32>
    %7 = arith.addf %4, %6 : vector<8x128xf32>
    %8 = vector.broadcast %1 : f32 to vector<8x128xf32>
    %9 = arith.cmpf oge, %7, %8 : vector<8x128xf32>
    %cst_8 = arith.constant 0.000000e+00 : f32
    %10 = vector.broadcast %0 : f32 to vector<8x128xf32>
    %11 = vector.broadcast %cst_8 : f32 to vector<8x128xf32>
    %12 = arith.select %9, %10, %11 : vector<8x128xi1>, vector<8x128xf32>
    %13 = arith.subf %7, %12 : vector<8x128xf32>
    %c0_9 = arith.constant 0 : index
    %c0_10 = arith.constant 0 : index
    %14 = vector.load %arg4[%c0_9, %c0_10] : memref<8x128xf32, #tpu.memory_space<vmem>>, vector<8x128xf32>
    tpu.vector_store %arg4[%c0_9, %c0_10], %13 {strides = array<i32>} : memref<8x128xf32, #tpu.memory_space<vmem>>, vector<8x128xf32>,
    %c0_11 = arith.constant 0 : index
    %c0_12 = arith.constant 0 : index
    %c0_13 = arith.constant 0 : index
    %15 = vector.load %arg3[%c0_11, %c0_12, %c0_13] : memref<8x8x128xf32, #tpu.memory_space<vmem>>, vector<1x8x128xf32>
    %16 = vector.shape_cast %15 : vector<1x8x128xf32> to vector<8x128xf32>
    %17 = vector.shape_cast %12 : vector<8x128xf32> to vector<1x8x128xf32>
    tpu.vector_store %arg3[%c0_11, %c0_12, %c0_13], %17 {strides = array<i32>} : memref<8x8x128xf32, #tpu.memory_space<vmem>>, vector<1x8x128xf32>,
    %c0_14 = arith.constant 0 : index
    %c0_15 = arith.constant 0 : index
    %18 = vector.load %arg4[%c0_14, %c0_15] : memref<8x128xf32, #tpu.memory_space<vmem>>, vector<8x128xf32>
    %c1 = arith.constant 1 : index
    %c0_16 = arith.constant 0 : index
    %c0_17 = arith.constant 0 : index
    %19 = vector.load %arg1[%c1, %c0_16, %c0_17] : memref<8x8x128xf32, #tpu.memory_space<vmem>>, vector<1x8x128xf32>
    %20 = vector.shape_cast %19 : vector<1x8x128xf32> to vector<8x128xf32>
    %21 = arith.addf %18, %20 : vector<8x128xf32>
    %22 = vector.broadcast %1 : f32 to vector<8x128xf32>
    %23 = arith.cmpf oge, %21, %22 : vector<8x128xf32>
    %cst_18 = arith.constant 0.000000e+00 : f32
    %24 = vector.broadcast %0 : f32 to vector<8x128xf32>
    %25 = vector.broadcast %cst_18 : f32 to vector<8x128xf32>
    %26 = arith.select %23, %24, %25 : vector<8x128xi1>, vector<8x128xf32>
    %27 = arith.subf %21, %26 : vector<8x128xf32>
    %c0_19 = arith.constant 0 : index
    %c0_20 = arith.constant 0 : index
    %28 = vector.load %arg4[%c0_19, %c0_20] : memref<8x128xf32, #tpu.memory_space<vmem>>, vector<8x128xf32>
    tpu.vector_store %arg4[%c0_19, %c0_20], %27 {strides = array<i32>} : memref<8x128xf32, #tpu.memory_space<vmem>>, vector<8x128xf32>,
    %c1_21 = arith.constant 1 : index
    %c0_22 = arith.constant 0 : index
    %c0_23 = arith.constant 0 : index
    %29 = vector.load %arg3[%c1_21, %c0_22, %c0_23] : memref<8x8x128xf32, #tpu.memory_space<vmem>>, vector<1x8x128xf32>
    %30 = vector.shape_cast %29 : vector<1x8x128xf32> to vector<8x128xf32>
    %31 = vector.shape_cast %26 : vector<8x128xf32> to vector<1x8x128xf32>
    tpu.vector_store %arg3[%c1_21, %c0_22, %c0_23], %31 {strides = array<i32>} : memref<8x8x128xf32, #tpu.memory_space<vmem>>, vector<1x8x128xf32>,
    %c0_24 = arith.constant 0 : index
    %c0_25 = arith.constant 0 : index
    %32 = vector.load %arg4[%c0_24, %c0_25] : memref<8x128xf32, #tpu.memory_space<vmem>>, vector<8x128xf32>
    %c2 = arith.constant 2 : index
    %c0_26 = arith.constant 0 : index
    %c0_27 = arith.constant 0 : index
    %33 = vector.load %arg1[%c2, %c0_26, %c0_27] : memref<8x8x128xf32, #tpu.memory_space<vmem>>, vector<1x8x128xf32>
    %34 = vector.shape_cast %33 : vector<1x8x128xf32> to vector<8x128xf32>
    %35 = arith.addf %32, %34 : vector<8x128xf32>
    %36 = vector.broadcast %1 : f32 to vector<8x128xf32>
    %37 = arith.cmpf oge, %35, %36 : vector<8x128xf32>
    %cst_28 = arith.constant 0.000000e+00 : f32
    %38 = vector.broadcast %0 : f32 to vector<8x128xf32>
    %39 = vector.broadcast %cst_28 : f32 to vector<8x128xf32>
    %40 = arith.select %37, %38, %39 : vector<8x128xi1>, vector<8x128xf32>
    %41 = arith.subf %35, %40 : vector<8x128xf32>
    %c0_29 = arith.constant 0 : index
    %c0_30 = arith.constant 0 : index
    %42 = vector.load %arg4[%c0_29, %c0_30] : memref<8x128xf32, #tpu.memory_space<vmem>>, vector<8x128xf32>
    tpu.vector_store %arg4[%c0_29, %c0_30], %41 {strides = array<i32>} : memref<8x128xf32, #tpu.memory_space<vmem>>, vector<8x128xf32>,
    %c2_31 = arith.constant 2 : index
    %c0_32 = arith.constant 0 : index
    %c0_33 = arith.constant 0 : index
    %43 = vector.load %arg3[%c2_31, %c0_32, %c0_33] : memref<8x8x128xf32, #tpu.memory_space<vmem>>, vector<1x8x128xf32>
    %44 = vector.shape_cast %43 : vector<1x8x128xf32> to vector<8x128xf32>
    %45 = vector.shape_cast %40 : vector<8x128xf32> to vector<1x8x128xf32>
    tpu.vector_store %arg3[%c2_31, %c0_32, %c0_33], %45 {strides = array<i32>} : memref<8x8x128xf32, #tpu.memory_space<vmem>>, vector<1x8x128xf32>,
    %c0_34 = arith.constant 0 : index
    %c0_35 = arith.constant 0 : index
    %46 = vector.load %arg4[%c0_34, %c0_35] : memref<8x128xf32, #tpu.memory_space<vmem>>, vector<8x128xf32>
    %c3 = arith.constant 3 : index
    %c0_36 = arith.constant 0 : index
    %c0_37 = arith.constant 0 : index
    %47 = vector.load %arg1[%c3, %c0_36, %c0_37] : memref<8x8x128xf32, #tpu.memory_space<vmem>>, vector<1x8x128xf32>
    %48 = vector.shape_cast %47 : vector<1x8x128xf32> to vector<8x128xf32>
    %49 = arith.addf %46, %48 : vector<8x128xf32>
    %50 = vector.broadcast %1 : f32 to vector<8x128xf32>
    %51 = arith.cmpf oge, %49, %50 : vector<8x128xf32>
    %cst_38 = arith.constant 0.000000e+00 : f32
    %52 = vector.broadcast %0 : f32 to vector<8x128xf32>
    %53 = vector.broadcast %cst_38 : f32 to vector<8x128xf32>
    %54 = arith.select %51, %52, %53 : vector<8x128xi1>, vector<8x128xf32>
    %55 = arith.subf %49, %54 : vector<8x128xf32>
    %c0_39 = arith.constant 0 : index
    %c0_40 = arith.constant 0 : index
    %56 = vector.load %arg4[%c0_39, %c0_40] : memref<8x128xf32, #tpu.memory_space<vmem>>, vector<8x128xf32>
    tpu.vector_store %arg4[%c0_39, %c0_40], %55 {strides = array<i32>} : memref<8x128xf32, #tpu.memory_space<vmem>>, vector<8x128xf32>,
    %c3_41 = arith.constant 3 : index
    %c0_42 = arith.constant 0 : index
    %c0_43 = arith.constant 0 : index
    %57 = vector.load %arg3[%c3_41, %c0_42, %c0_43] : memref<8x8x128xf32, #tpu.memory_space<vmem>>, vector<1x8x128xf32>
    %58 = vector.shape_cast %57 : vector<1x8x128xf32> to vector<8x128xf32>
    %59 = vector.shape_cast %54 : vector<8x128xf32> to vector<1x8x128xf32>
    tpu.vector_store %arg3[%c3_41, %c0_42, %c0_43], %59 {strides = array<i32>} : memref<8x8x128xf32, #tpu.memory_space<vmem>>, vector<1x8x128xf32>,
    %c0_44 = arith.constant 0 : index
    %c0_45 = arith.constant 0 : index
    %60 = vector.load %arg4[%c0_44, %c0_45] : memref<8x128xf32, #tpu.memory_space<vmem>>, vector<8x128xf32>
    %c4 = arith.constant 4 : index
    %c0_46 = arith.constant 0 : index
    %c0_47 = arith.constant 0 : index
    %61 = vector.load %arg1[%c4, %c0_46, %c0_47] : memref<8x8x128xf32, #tpu.memory_space<vmem>>, vector<1x8x128xf32>
    %62 = vector.shape_cast %61 : vector<1x8x128xf32> to vector<8x128xf32>
    %63 = arith.addf %60, %62 : vector<8x128xf32>
    %64 = vector.broadcast %1 : f32 to vector<8x128xf32>
    %65 = arith.cmpf oge, %63, %64 : vector<8x128xf32>
    %cst_48 = arith.constant 0.000000e+00 : f32
    %66 = vector.broadcast %0 : f32 to vector<8x128xf32>
    %67 = vector.broadcast %cst_48 : f32 to vector<8x128xf32>
    %68 = arith.select %65, %66, %67 : vector<8x128xi1>, vector<8x128xf32>
    %69 = arith.subf %63, %68 : vector<8x128xf32>
    %c0_49 = arith.constant 0 : index
    %c0_50 = arith.constant 0 : index
    %70 = vector.load %arg4[%c0_49, %c0_50] : memref<8x128xf32, #tpu.memory_space<vmem>>, vector<8x128xf32>
    tpu.vector_store %arg4[%c0_49, %c0_50], %69 {strides = array<i32>} : memref<8x128xf32, #tpu.memory_space<vmem>>, vector<8x128xf32>,
    %c4_51 = arith.constant 4 : index
    %c0_52 = arith.constant 0 : index
    %c0_53 = arith.constant 0 : index
    %71 = vector.load %arg3[%c4_51, %c0_52, %c0_53] : memref<8x8x128xf32, #tpu.memory_space<vmem>>, vector<1x8x128xf32>
    %72 = vector.shape_cast %71 : vector<1x8x128xf32> to vector<8x128xf32>
    %73 = vector.shape_cast %68 : vector<8x128xf32> to vector<1x8x128xf32>
    tpu.vector_store %arg3[%c4_51, %c0_52, %c0_53], %73 {strides = array<i32>} : memref<8x8x128xf32, #tpu.memory_space<vmem>>, vector<1x8x128xf32>,
    %c0_54 = arith.constant 0 : index
    %c0_55 = arith.constant 0 : index
    %74 = vector.load %arg4[%c0_54, %c0_55] : memref<8x128xf32, #tpu.memory_space<vmem>>, vector<8x128xf32>
    %c5 = arith.constant 5 : index
    %c0_56 = arith.constant 0 : index
    %c0_57 = arith.constant 0 : index
    %75 = vector.load %arg1[%c5, %c0_56, %c0_57] : memref<8x8x128xf32, #tpu.memory_space<vmem>>, vector<1x8x128xf32>
    %76 = vector.shape_cast %75 : vector<1x8x128xf32> to vector<8x128xf32>
    %77 = arith.addf %74, %76 : vector<8x128xf32>
    %78 = vector.broadcast %1 : f32 to vector<8x128xf32>
    %79 = arith.cmpf oge, %77, %78 : vector<8x128xf32>
    %cst_58 = arith.constant 0.000000e+00 : f32
    %80 = vector.broadcast %0 : f32 to vector<8x128xf32>
    %81 = vector.broadcast %cst_58 : f32 to vector<8x128xf32>
    %82 = arith.select %79, %80, %81 : vector<8x128xi1>, vector<8x128xf32>
    %83 = arith.subf %77, %82 : vector<8x128xf32>
    %c0_59 = arith.constant 0 : index
    %c0_60 = arith.constant 0 : index
    %84 = vector.load %arg4[%c0_59, %c0_60] : memref<8x128xf32, #tpu.memory_space<vmem>>, vector<8x128xf32>
    tpu.vector_store %arg4[%c0_59, %c0_60], %83 {strides = array<i32>} : memref<8x128xf32, #tpu.memory_space<vmem>>, vector<8x128xf32>,
    %c5_61 = arith.constant 5 : index
    %c0_62 = arith.constant 0 : index
    %c0_63 = arith.constant 0 : index
    %85 = vector.load %arg3[%c5_61, %c0_62, %c0_63] : memref<8x8x128xf32, #tpu.memory_space<vmem>>, vector<1x8x128xf32>
    %86 = vector.shape_cast %85 : vector<1x8x128xf32> to vector<8x128xf32>
    %87 = vector.shape_cast %82 : vector<8x128xf32> to vector<1x8x128xf32>
    tpu.vector_store %arg3[%c5_61, %c0_62, %c0_63], %87 {strides = array<i32>} : memref<8x8x128xf32, #tpu.memory_space<vmem>>, vector<1x8x128xf32>,
    %c0_64 = arith.constant 0 : index
    %c0_65 = arith.constant 0 : index
    %88 = vector.load %arg4[%c0_64, %c0_65] : memref<8x128xf32, #tpu.memory_space<vmem>>, vector<8x128xf32>
    %c6 = arith.constant 6 : index
    %c0_66 = arith.constant 0 : index
    %c0_67 = arith.constant 0 : index
    %89 = vector.load %arg1[%c6, %c0_66, %c0_67] : memref<8x8x128xf32, #tpu.memory_space<vmem>>, vector<1x8x128xf32>
    %90 = vector.shape_cast %89 : vector<1x8x128xf32> to vector<8x128xf32>
    %91 = arith.addf %88, %90 : vector<8x128xf32>
    %92 = vector.broadcast %1 : f32 to vector<8x128xf32>
    %93 = arith.cmpf oge, %91, %92 : vector<8x128xf32>
    %cst_68 = arith.constant 0.000000e+00 : f32
    %94 = vector.broadcast %0 : f32 to vector<8x128xf32>
    %95 = vector.broadcast %cst_68 : f32 to vector<8x128xf32>
    %96 = arith.select %93, %94, %95 : vector<8x128xi1>, vector<8x128xf32>
    %97 = arith.subf %91, %96 : vector<8x128xf32>
    %c0_69 = arith.constant 0 : index
    %c0_70 = arith.constant 0 : index
    %98 = vector.load %arg4[%c0_69, %c0_70] : memref<8x128xf32, #tpu.memory_space<vmem>>, vector<8x128xf32>
    tpu.vector_store %arg4[%c0_69, %c0_70], %97 {strides = array<i32>} : memref<8x128xf32, #tpu.memory_space<vmem>>, vector<8x128xf32>,
    %c6_71 = arith.constant 6 : index
    %c0_72 = arith.constant 0 : index
    %c0_73 = arith.constant 0 : index
    %99 = vector.load %arg3[%c6_71, %c0_72, %c0_73] : memref<8x8x128xf32, #tpu.memory_space<vmem>>, vector<1x8x128xf32>
    %100 = vector.shape_cast %99 : vector<1x8x128xf32> to vector<8x128xf32>
    %101 = vector.shape_cast %96 : vector<8x128xf32> to vector<1x8x128xf32>
    tpu.vector_store %arg3[%c6_71, %c0_72, %c0_73], %101 {strides = array<i32>} : memref<8x8x128xf32, #tpu.memory_space<vmem>>, vector<1x8x128xf32>,
    %c0_74 = arith.constant 0 : index
    %c0_75 = arith.constant 0 : index
    %102 = vector.load %arg4[%c0_74, %c0_75] : memref<8x128xf32, #tpu.memory_space<vmem>>, vector<8x128xf32>
    %c7 = arith.constant 7 : index
    %c0_76 = arith.constant 0 : index
    %c0_77 = arith.constant 0 : index
    %103 = vector.load %arg1[%c7, %c0_76, %c0_77] : memref<8x8x128xf32, #tpu.memory_space<vmem>>, vector<1x8x128xf32>
    %104 = vector.shape_cast %103 : vector<1x8x128xf32> to vector<8x128xf32>
    %105 = arith.addf %102, %104 : vector<8x128xf32>
    %106 = vector.broadcast %1 : f32 to vector<8x128xf32>
    %107 = arith.cmpf oge, %105, %106 : vector<8x128xf32>
    %cst_78 = arith.constant 0.000000e+00 : f32
    %108 = vector.broadcast %0 : f32 to vector<8x128xf32>
    %109 = vector.broadcast %cst_78 : f32 to vector<8x128xf32>
    %110 = arith.select %107, %108, %109 : vector<8x128xi1>, vector<8x128xf32>
    %111 = arith.subf %105, %110 : vector<8x128xf32>
    %c0_79 = arith.constant 0 : index
    %c0_80 = arith.constant 0 : index
    %112 = vector.load %arg4[%c0_79, %c0_80] : memref<8x128xf32, #tpu.memory_space<vmem>>, vector<8x128xf32>
    tpu.vector_store %arg4[%c0_79, %c0_80], %111 {strides = array<i32>} : memref<8x128xf32, #tpu.memory_space<vmem>>, vector<8x128xf32>,
    %c7_81 = arith.constant 7 : index
    %c0_82 = arith.constant 0 : index
    %c0_83 = arith.constant 0 : index
    %113 = vector.load %arg3[%c7_81, %c0_82, %c0_83] : memref<8x8x128xf32, #tpu.memory_space<vmem>>, vector<1x8x128xf32>
    %114 = vector.shape_cast %113 : vector<1x8x128xf32> to vector<8x128xf32>
    %115 = vector.shape_cast %110 : vector<8x128xf32> to vector<1x8x128xf32>
    tpu.vector_store %arg3[%c7_81, %c0_82, %c0_83], %115 {strides = array<i32>} : memref<8x8x128xf32, #tpu.memory_space<vmem>>, vector<1x8x128xf32>,
    return
  }
  func.func @transform_0(%arg0: i32) -> (i32, i32, i32) {
    %c0_i32 = arith.constant 0 : i32
    %c0_i32_0 = arith.constant 0 : i32
    %c0_i32_1 = arith.constant 0 : i32
    return %c0_i32, %arg0, %c0_i32_0 : i32, i32, i32
  }
  func.func @transform_1(%arg0: i32) -> i32 {
    %c0_i32 = arith.constant 0 : i32
    %c0_i32_0 = arith.constant 0 : i32
    return %c0_i32 : i32
  }
  func.func @transform_2(%arg0: i32) -> (i32, i32, i32) {
    %c0_i32 = arith.constant 0 : i32
    %c0_i32_0 = arith.constant 0 : i32
    %c0_i32_1 = arith.constant 0 : i32
    return %c0_i32, %arg0, %c0_i32_0 : i32, i32, i32
  }
}

</mosaic_0001>

<bundles_post_ra>
// kernel: tpu_custom_call.1
= control target key start
LH: loop header
LB: loop body
LE: loop exit
PB: predicated region body
PF: predicated region fallthrough
CT: control target
= control target key end

     0   :  { %s681_s0 = inlined_call_operand.hbm [shape: f32[8,16,128], index: 0, kind: input, shape index: {}]   ;;  %s682_s1 = inlined_call_operand.<no memory space> [shape: f32[1], index: 1, kind: input, shape index: {}]   ;;  %s683_s2 = inlined_call_operand.hbm [shape: f32[8,16,128], index: 2, kind: output, shape index: {}]  }
   0x1   :  { %7 = sst [smem:[#allocation3]] %s682_s1 }
   0x2   :  { %8 = vsyncpa [#allocation5], 0 }
   0x3   :  { %10 = vsyncpa [#allocation5 + $0x1], 0 }
   0x4   :  { %11 = vsyncpa [#allocation6], 0 }
   0x5   :  { %13 = vsyncpa [#allocation6 + $0x1], 0  ;;  %s535_s11 = smov 0   ;;  %s537_s12 = smov 0  }
   0x6   :  { %s539_s13 = smov 0   ;;  %s541_s14 = smov 0  }
   0x7 LB: > { %s556_s1 = sadd.s32 4294967295, %s509_s14   ;;  %s335_s15 = sadd.s32 4294967294, %s509_s14   ;;  %s509_s14 = sphi %s541_s14, %s692_s14   ;;  %s505_s13 = sphi %s539_s13, %s691_s13   ;;  %s501_s12 = sphi %s537_s12, %s690_s12   ;;  %s497_s11 = sphi %s535_s11, %s689_s11  }
   0x8   : > { %s560_s16 = sadd.s32 1, %s509_s14   ;;  %s26_s17 = sadd.s32 1, %s505_s13 }
   0x9   : > { %s23_s18 = ssub.s32 %s509_s14, %s560_s16  ;;  %p33_p0 = scmp.ne.s32.totalorder %s505_s13, %s501_s12 }
   0xa   : > { %p24_p1 = scmp.eq.s32.totalorder %s23_s18, 0  ;;  %p34_p2 = scmp.eq.s32.totalorder %s509_s14, 0 }
   0xb   : > { %p39_p3 = scmp.ne.s32.totalorder %s501_s12, %s497_s11  ;;  %p40_p4 = scmp.eq.s32.totalorder %s556_s1, 0 }
   0xc   : > { %s572_s19 = scalar_select %p24_p1, %s505_s13, %s26_s17  }
   0xd   : > { %p574_p5 = por %p34_p2, %p33_p0  ;;  %p578_p6 = por %p40_p4, %p39_p3 }
   0xe   : > { %p84_p7 = scmp.eq.s32.totalorder %s556_s1, 1  ;;  %p90_p8 = scmp.eq.s32.totalorder %s335_s15, 1 }
   0xf   : > { %p337_p9 = scmp.ge.s32.totalorder %s509_s14, 2  ;;  %p373_p10 = scmp.lt.s32.totalorder %s509_s14, 2 }
  0x10   : > { %p585_p11 = por %p84_p7, %p33_p0  ;;  %p589_p12 = por %p90_p8, %p39_p3 }
  0x11   : > { %s113_s24 = sand.u32 1, %s505_s13   ;;  %s339_s25 = sshll.u32 %s509_s14, 3 }
  0x12   : > { %s338_s26 = sshll.u32 %s113_s24, 6  ;;  %s121_s29 = scalar_lea.hbm %s681_s0, %s339_s25 }
  0x13   : > { %s122_s30 = sshll.u32 %s121_s29, 4  ;;  %s117_s3 = scalar_lea.vmem [#allocation4], %s338_s26  ;;  %s123_s30 = int_to_ptr.hbm [resolvable:$true] %s122_s30 }
  0x14   : > { %s124_s4 = sshll.u32 %s117_s3, 4  ;;  %p600_p13 = pnand %p373_p10, %p574_p5  ;;  %s125_s4 = int_to_ptr.vmem [resolvable:$true] %s124_s4 }
  0x15   : > { %p340_p0 = scmp.ge.s32.totalorder %s509_s14, 1  ;;  %s114_s6 = scalar_lea.sflag [#allocation5], %s113_s24 }
  0x16   : > { %s413_s7 = sshra.s32 %s123_s30, 4  ;;  %p417_p2 = pneg %p600_p13  ;;  %s414_s7 = int_to_ptr.hbm [resolvable:$true] %s413_s7 }
  0x17   : > { %s415_s8 = scalar_lea.hbm %s414_s7, 64  ;;  %s420_s15 = scalar_lea.hbm %s681_s0, 128 }
  0x18   : > { %p416_p1 = scmp.ne.s32.totalorder %s414_s7, %s415_s8  ;;  %p421_p5 = scmp.lt.s32.totalorder %s414_s7, %s681_s0 }
  0x19   : > { %p422_p7 = scmp.lt.s32.totalorder %s420_s15, %s415_s8 }
  0x1a   : > { %p418_p3 = pnand %p417_p2, %p416_p1 }
  0x1b   : > { %p423_p8 = por %p422_p7, %p421_p5 }
  0x1c   : > { %p419_p4 = pneg %p418_p3 }
  0x1e   : > { %p424_p10 = pnand %p423_p8, %p419_p4 }
  0x20   : > { %427 = shalt.err (!%p424_p10)
}
  0x21   : > { %s511_s20 = smov 256   ;;  %s512_s24 = smov 128  }
  0x22   : > { %s513_s25 = smov 8   ;;  %p132_p1 = scmp.lt.s32.totalorder %s509_s14, 3 }
  0x23   : > { %368 = dma.hbm_to_vmem [thread:$0]  (!%p600_p13), %s123_s30, 1024, %s125_s4, %s114_s6, %s511_s20, %s512_s24, %s513_s25  }
  0x24   : > { %p133_p2 = pnand %p340_p0, %p132_p1 }
  0x25   : > { %s619_s26 = sand.u32 (!%p133_p2), 1, %s501_s12  }
  0x26   : > { %136 = sbr.rel (%p133_p2) target bundleno = 102 (0x66), region = 28  ;;  %s341_s27 = sshll.u32 (!%p133_p2), %s619_s26, 6 }
  0x27   : > { %s139_s28 = scalar_lea.sflag (!%p133_p2), [#allocation5], %s619_s26  ;;  %s623_s29 = scalar_lea.vmem (!%p133_p2), [#allocation4], %s341_s27 }
  0x2b   : > { %488 = dma.done.wait (%p578_p6), %s139_s28, 1024  }
  0x2c   : > { %490 = vsyncadd (%p578_p6), %s139_s28, 4294966272  ;;  %s164_s30 = sld [smem:[#allocation3]]  ;;  %v168_v0 = vld [vmem:[%s623_s29] sm:$0xff]  ;;  %v343_v4 = vld [vmem:[%s623_s29 + $0x8] sm:$0xff]  ;;  %s631_s4 = scalar_lea.vmem [#allocation7], %s341_s27 }
  0x2d   : > { %v345_v8 = vld [vmem:[%s623_s29 + $0x10] sm:$0xff]  ;;  %v347_v12 = vld [vmem:[%s623_s29 + $0x18] sm:$0xff]  ;;  %v349_v16 = vld [vmem:[%s623_s29 + $0x20] sm:$0xff]  ;;  %s358_s21 = sshll.u32 %s556_s1, 3  ;;  %s259_s8 = sshll.u32 %s631_s4, 4  ;;  %s260_s8 = int_to_ptr.vmem [resolvable:$true] %s259_s8 }
  0x2e   : > { %v351_v20 = vld [vmem:[%s623_s29 + $0x28] sm:$0xff]  ;;  %v353_v24 = vld [vmem:[%s623_s29 + $0x30] sm:$0xff]  ;;  %s258_s7 = scalar_lea.hbm %s683_s2, %s358_s21  ;;  %v355_v28 = vld [vmem:[%s623_s29 + $0x38] sm:$0xff]  ;;  %s248_s1 = scalar_lea.sflag [#allocation6], %s619_s26 }
  0x2f   : > { %s261_s9 = sshll.u32 %s258_s7, 4  ;;  %s463_s20 = scalar_lea.hbm %s683_s2, 128  ;;  %s262_s9 = int_to_ptr.hbm [resolvable:$true] %s261_s9 }
  0x30   : > { %s457_s10 = sshra.s32 %s262_s9, 4  ;;  %s458_s10 = int_to_ptr.hbm [resolvable:$true] %s457_s10 }
  0x31   : > { %s459_s15 = scalar_lea.hbm %s458_s10, 64  ;;  %p464_p3 = scmp.lt.s32.totalorder %s458_s10, %s683_s2 }
  0x32   : > { %s165_s3 = smul.f32 0.5, %s164_s30  ;;  %v172_v1 = vstv %s164_s30  ;;  %p460_p6 = scmp.ne.s32.totalorder %s458_s10, %s459_s15 }
  0x33   : > { %p465_p4 = scmp.lt.s32.totalorder %s463_s20, %s459_s15 }
  0x34   : > { %v170_v2 = vstv %s165_s3  ;;  %p461_p13 = pnand %p460_p6, %p585_p11 }
  0x35   : > { %vm171_vm0 = vcmp.ge.f32.partialorder %v168_v0, %v170_v2  ;;  %p466_p5 = por %p465_p4, %p464_p3 }
  0x36   : > { %v173_v3 = vsel %vm171_vm0, %v172_v1, 0.0  ;;  %p462_p0 = pneg %p461_p13 }
  0x37   : > { %v174_v5 = vsub.f32 %v168_v0, %v173_v3  ;;  %176 = vst [vmem:[%s631_s4] sm:$0xff] %v173_v3 }
  0x38   : > { %p467_p7 = pnand %p466_p5, %p462_p0 }
  0x39   : > { %v180_v6 = vadd.f32 %v343_v4, %v174_v5 }
  0x3b   : > { %vm181_vm1 = vcmp.ge.f32.partialorder %v180_v6, %v170_v2 }
  0x3c   : > { %v182_v7 = vsel %vm181_vm1, %v172_v1, 0.0 }
  0x3d   : > { %v183_v9 = vsub.f32 %v180_v6, %v182_v7  ;;  %344 = vst [vmem:[%s631_s4 + $0x8] sm:$0xff] %v182_v7 }
  0x3f   : > { %v190_v10 = vadd.f32 %v345_v8, %v183_v9 }
  0x41   : > { %vm191_vm2 = vcmp.ge.f32.partialorder %v190_v10, %v170_v2 }
  0x42   : > { %v192_v11 = vsel %vm191_vm2, %v172_v1, 0.0 }
  0x43   : > { %v193_v13 = vsub.f32 %v190_v10, %v192_v11  ;;  %346 = vst [vmem:[%s631_s4 + $0x10] sm:$0xff] %v192_v11 }
  0x45   : > { %v200_v14 = vadd.f32 %v347_v12, %v193_v13 }
  0x47   : > { %vm201_vm3 = vcmp.ge.f32.partialorder %v200_v14, %v170_v2 }
  0x48   : > { %v202_v15 = vsel %vm201_vm3, %v172_v1, 0.0 }
  0x49   : > { %v203_v17 = vsub.f32 %v200_v14, %v202_v15  ;;  %348 = vst [vmem:[%s631_s4 + $0x18] sm:$0xff] %v202_v15 }
  0x4b   : > { %v210_v18 = vadd.f32 %v349_v16, %v203_v17 }
  0x4d   : > { %vm211_vm4 = vcmp.ge.f32.partialorder %v210_v18, %v170_v2 }
  0x4e   : > { %v212_v19 = vsel %vm211_vm4, %v172_v1, 0.0 }
  0x4f   : > { %v213_v21 = vsub.f32 %v210_v18, %v212_v19  ;;  %350 = vst [vmem:[%s631_s4 + $0x20] sm:$0xff] %v212_v19 }
  0x51   : > { %v220_v22 = vadd.f32 %v351_v20, %v213_v21 }
  0x53   : > { %vm221_vm5 = vcmp.ge.f32.partialorder %v220_v22, %v170_v2 }
  0x54   : > { %v222_v23 = vsel %vm221_vm5, %v172_v1, 0.0 }
  0x55   : > { %v223_v25 = vsub.f32 %v220_v22, %v222_v23  ;;  %352 = vst [vmem:[%s631_s4 + $0x28] sm:$0xff] %v222_v23 }
  0x57   : > { %v230_v26 = vadd.f32 %v353_v24, %v223_v25 }
  0x59   : > { %vm231_vm6 = vcmp.ge.f32.partialorder %v230_v26, %v170_v2 }
  0x5a   : > { %v232_v27 = vsel %vm231_vm6, %v172_v1, 0.0 }
  0x5b   : > { %v233_v29 = vsub.f32 %v230_v26, %v232_v27  ;;  %354 = vst [vmem:[%s631_s4 + $0x30] sm:$0xff] %v232_v27 }
  0x5d   : > { %v240_v30 = vadd.f32 %v355_v28, %v233_v29 }
  0x5f   : > { %vm241_vm7 = vcmp.ge.f32.partialorder %v240_v30, %v170_v2 }
  0x60   : > { %v242_v31 = vsel %vm241_vm7, %v172_v1, 0.0 }
  0x61   : > { %356 = vst [vmem:[%s631_s4 + $0x38] sm:$0xff] %v242_v31 }
  0x62   : > { %470 = shalt.err (!%p467_p7)
}
  0x63   : > { %s514_s26 = smov 128   ;;  %s515_s27 = smov 256  }
  0x64   : > { %s516_s28 = smov 8  }
  0x65   : > { %363 = dma.vmem_to_hbm [thread:$0]  (%p585_p11), %s260_s8, 1024, %s262_s9, %s248_s1, %s514_s26, %s515_s27, %s516_s28  }
  0x66 PF: > { %s276_s29 = sand.u32 1, %s497_s11   ;;  %p370_p8 = pnand %p337_p9, %p589_p12 }
  0x67   : > { %s277_s30 = scalar_lea.sflag [#allocation6], %s276_s29 }
  0x68   : > { %p371_p10 = pneg %p370_p8 }
  0x6a   : > { %492 = dma.done.wait (%p371_p10), %s277_s30, 1024  }
  0x6b   : > { %494 = vsyncadd (%p371_p10), %s277_s30, 4294966272  ;;  %p16_p1 = scmp.ge.s32.totalorder %s560_s16, 4   ;;  %s689_s11 = smov %s501_s12 }
  0x6c   : > { %s690_s12 = smov %s505_s13  ;;  %s691_s13 = smov %s572_s19 }
  0x6d   : > { %s692_s14 = smov %s560_s16  ;;  %18 = sbr.rel (!%p16_p1) target bundleno = 7 (0x7), region = 87 }
  0x72   :  { %283 = vsyncpa [#allocation5], 1 }
  0x73   :  { %285 = vsyncpa [#allocation5 + $0x1], 1 }
  0x74   :  { %286 = vsyncpa [#allocation6], 1 }
  0x75   :  { %288 = vsyncpa [#allocation6 + $0x1], 1 }

</bundles_post_ra>
